<compile_context>
chip_gen: v6e
topology: v6e:2x2x1
jax: 0.10.0
libtpu: 0.0.40
codegen_flags: <defaults>
</compile_context>

<pallas_src>
import functools

import jax
import jax.numpy as jnp
from jax import lax
from jax.experimental import pallas as pl
from jax.experimental.pallas import tpu as pltpu


def fire_kernel(x_ref, mask_ref, wsq_ref, bsq_ref, w1_ref, b1_ref,
                w3_ref, b3_ref, out_ref, k_ref, *, W):
    """One batch-block per grid step (channels-first, batch*spatial on lanes).

    x_ref:    (Cin_p, L)        bf16 input slab (L = images_per_step * H * W)
    mask_ref: (8, L)            f32 0/1 boundary masks for the 8 non-center taps
    wsq_ref:  (Csq_p, Cin_p)    bf16 squeeze 1x1 weights
    bsq_ref:  (Csq_p, 1)        f32 squeeze bias
    w1_ref:   (Ce1_p, Csq_p)    bf16 expand1x1 weights
    b1_ref:   (Ce1_p, 1)        f32 expand1x1 bias
    w3_ref:   (Ce3_p, 9*Csq_p)  bf16 expand3x3 weights (tap-major columns)
    b3_ref:   (Ce3_p, 1)        f32 expand3x3 bias
    out_ref:  (Ce1_p+Ce3_p, L)  f32 output, channels = [expand1x1 | expand3x3]
    k_ref:    (9*Csq_p, L)      bf16 scratch holding the im2col taps
    """
    L = x_ref.shape[-1]
    Csq_p = wsq_ref.shape[0]
    Ce1_p = w1_ref.shape[0]
    Ce3_p = w3_ref.shape[0]

    # ---- squeeze 1x1 + ReLU: bf16 MXU operands, f32 accumulate/elementwise ----
    s = jnp.dot(wsq_ref[...], x_ref[...], preferred_element_type=jnp.float32)
    s = jnp.maximum(s + bsq_ref[...], 0.0)                      # (Csq_p, L) f32
    s_b = s.astype(jnp.bfloat16)

    # ---- expand1x1 + ReLU: its own matmul on the resident squeeze output ----
    e1 = jnp.dot(w1_ref[...], s_b, preferred_element_type=jnp.float32)
    out_ref[pl.ds(0, Ce1_p), :] = jnp.maximum(e1 + b1_ref[...], 0.0)

    # ---- im2col taps for the 3x3 conv: lane rolls (XLU) + precomputed masks,
    #      written straight into the sublane-aligned bf16 scratch ----
    m = 0
    for sh in (-1, 0, 1):           # tap row offset (kh = sh + 1)
        for sw in (-1, 0, 1):       # tap col offset (kw = sw + 1)
            t = (sh + 1) * 3 + (sw + 1)
            if sh == 0 and sw == 0:
                k_ref[pl.ds(t * Csq_p, Csq_p), :] = s_b         # center tap
            else:
                delta = sh * W + sw
                rolled = pltpu.roll(s, shift=(-delta) % L, axis=1)
                tap = rolled * mask_ref[pl.ds(m, 1), :]         # f32 mask mul
                k_ref[pl.ds(t * Csq_p, Csq_p), :] = tap.astype(jnp.bfloat16)
                m += 1

    # ---- expand3x3 + ReLU ----
    e3 = jnp.dot(w3_ref[...], k_ref[...], preferred_element_type=jnp.float32)
    out_ref[pl.ds(Ce1_p, Ce3_p), :] = jnp.maximum(e3 + b3_ref[...], 0.0)


def _round_up(n, m):
    return (n + m - 1) // m * m


def _pick_batch_block(N, HW, target_lanes=512):
    """Images per grid step: fatten steps, but keep >=2 steps for v7x megacore."""
    nb = max(1, target_lanes // HW)
    nb = min(nb, N)
    while nb > 1 and N // nb < 2:
        nb -= 1
    while N % nb:
        nb -= 1
    if (nb * HW) % 128:             # lane blocks must be 128-aligned unless full
        nb = N
    return nb


@jax.jit
def fire_forward(x_nchw, wsq, bsq, w1, b1, w3, b3):
    """Fire forward.

    x_nchw: (N, Cin, H, W)
    wsq:    (Csq, Cin)        squeeze 1x1 weight   (torch (Csq,Cin,1,1) squeezed)
    bsq:    (Csq,)
    w1:     (Ce1, Csq)        expand1x1 weight     (torch (Ce1,Csq,1,1) squeezed)
    b1:     (Ce1,)
    w3:     (Ce3, Csq, 3, 3)  expand3x3 weight, OIHW (torch layout)
    b3:     (Ce3,)
    Returns (N, Ce1+Ce3, H, W)  (NCHW, channels = [expand1x1 | expand3x3]).
    """
    N, Cin, H, W = x_nchw.shape
    Csq = wsq.shape[0]
    Ce1 = w1.shape[0]
    Ce3 = w3.shape[0]
    HW = H * W

    # --- alignment padding (bf16 sublane packing = 16 rows, f32 = 8 rows) ---
    Cin_p = _round_up(Cin, 8)
    Csq_p = _round_up(Csq, 16)
    Ce1_p = _round_up(Ce1, 8)
    Ce3_p = _round_up(Ce3, 8)
    Cout_p = Ce1_p + Ce3_p

    Nb = _pick_batch_block(N, HW)
    L = Nb * HW
    grid = (N // Nb,)

    # --- input: channels-first, batch folded into the lane axis, bf16 ---
    x_f = x_nchw.reshape(N, Cin, HW).astype(jnp.float32)
    if Cin_p > Cin:
        x_f = jnp.pad(x_f, ((0, 0), (0, Cin_p - Cin), (0, 0)))
    x_cl = jnp.transpose(x_f, (1, 0, 2)).reshape(Cin_p, N * HW).astype(jnp.bfloat16)

    # --- zero-padded weights (bf16 for the MXU), biases f32 ---
    wsq_p = jnp.zeros((Csq_p, Cin_p), jnp.float32).at[:Csq, :Cin].set(
        wsq.astype(jnp.float32)).astype(jnp.bfloat16)
    bsq_p = jnp.zeros((Csq_p, 1), jnp.float32).at[:Csq, 0].set(bsq.astype(jnp.float32))
    w1_p = jnp.zeros((Ce1_p, Csq_p), jnp.float32).at[:Ce1, :Csq].set(
        w1.astype(jnp.float32)).astype(jnp.bfloat16)
    b1_p = jnp.zeros((Ce1_p, 1), jnp.float32).at[:Ce1, 0].set(b1.astype(jnp.float32))
    # Column block t = kh*3 + kw of w3_flat holds tap (kh, kw), channel-minor.
    w3_pad = jnp.zeros((Ce3_p, Csq_p, 3, 3), jnp.float32).at[:Ce3, :Csq].set(
        w3.astype(jnp.float32))
    w3_flat = jnp.transpose(w3_pad, (0, 2, 3, 1)).reshape(
        Ce3_p, 9 * Csq_p).astype(jnp.bfloat16)
    b3_p = jnp.zeros((Ce3_p, 1), jnp.float32).at[:Ce3, 0].set(b3.astype(jnp.float32))

    # --- boundary masks for the 8 non-center taps, per image (constant input) ---
    idx = jnp.arange(L, dtype=jnp.int32) % HW
    row, col = idx // W, idx % W
    masks = []
    for sh in (-1, 0, 1):
        for sw in (-1, 0, 1):
            if sh == 0 and sw == 0:
                continue
            masks.append((row + sh >= 0) & (row + sh < H) &
                         (col + sw >= 0) & (col + sw < W))
    mask_arr = jnp.stack(masks, axis=0).astype(jnp.float32)        # (8, L)

    kernel = functools.partial(fire_kernel, W=W)

    out_cl = pl.pallas_call(
        kernel,
        out_shape=jax.ShapeDtypeStruct((Cout_p, N * HW), jnp.float32),
        grid_spec=pltpu.PrefetchScalarGridSpec(
            num_scalar_prefetch=0,
            grid=grid,
            in_specs=[
                pl.BlockSpec((Cin_p, L), lambda b: (0, b)),
                pl.BlockSpec((8, L), lambda b: (0, 0)),
                pl.BlockSpec((Csq_p, Cin_p), lambda b: (0, 0)),
                pl.BlockSpec((Csq_p, 1), lambda b: (0, 0)),
                pl.BlockSpec((Ce1_p, Csq_p), lambda b: (0, 0)),
                pl.BlockSpec((Ce1_p, 1), lambda b: (0, 0)),
                pl.BlockSpec((Ce3_p, 9 * Csq_p), lambda b: (0, 0)),
                pl.BlockSpec((Ce3_p, 1), lambda b: (0, 0)),
            ],
            out_specs=pl.BlockSpec((Cout_p, L), lambda b: (0, b)),
            scratch_shapes=[pltpu.VMEM((9 * Csq_p, L), jnp.bfloat16)],
        ),
        compiler_params=pltpu.CompilerParams(
            dimension_semantics=("parallel",)),
    )(x_cl, mask_arr, wsq_p, bsq_p, w1_p, b1_p, w3_flat, b3_p)

    # --- back to NCHW, channels = [expand1x1 | expand3x3] ---
    if Ce1_p == Ce1 and Ce3_p == Ce3:
        out_rows = out_cl
    else:
        out_rows = jnp.concatenate(
            [out_cl[:Ce1], out_cl[Ce1_p:Ce1_p + Ce3]], axis=0)
    out = out_rows.reshape(Ce1 + Ce3, N, HW)
    return jnp.transpose(out, (1, 0, 2)).reshape(N, Ce1 + Ce3, H, W)


def fire_reference(x_nchw, wsq, bsq, w1, b1, w3, b3):
    """Pure-JAX f32 reference (NCHW convs via lax.conv_general_dilated)."""
    Csq, Cin = wsq.shape
    Ce1 = w1.shape[0]
    dn = ("NCHW", "OIHW", "NCHW")

    def conv(inp, w_oihw, b, pad):
        y = lax.conv_general_dilated(inp.astype(jnp.float32),
                                     w_oihw.astype(jnp.float32),
                                     window_strides=(1, 1), padding=pad,
                                     dimension_numbers=dn)
        return y + b.reshape(1, -1, 1, 1)

    s = jax.nn.relu(conv(x_nchw, wsq.reshape(Csq, Cin, 1, 1), bsq, "VALID"))
    e1 = jax.nn.relu(conv(s, w1.reshape(Ce1, Csq, 1, 1), b1, "VALID"))
    e3 = jax.nn.relu(conv(s, w3, b3, "SAME"))
    return jnp.concatenate([e1, e3], axis=1)


if __name__ == "__main__":
    # Module hyperparams (small, consistent with Fire(inplanes, squeeze, e1, e3, bit_width)).
    N, Cin, H, W = 2, 4, 16, 16
    Csq, Ce1, Ce3 = 4, 8, 8
    # bit_width = [8, 8, 8]  # quantization not modeled (see TODO at top)

    key = jax.random.PRNGKey(0)
    ks = jax.random.split(key, 7)
    x = jax.random.normal(ks[0], (N, Cin, H, W), dtype=jnp.float32)

    wsq = jax.random.normal(ks[1], (Csq, Cin), dtype=jnp.float32) * 0.2
    bsq = jax.random.normal(ks[2], (Csq,), dtype=jnp.float32) * 0.05
    w1 = jax.random.normal(ks[3], (Ce1, Csq), dtype=jnp.float32) * 0.2
    b1 = jax.random.normal(ks[4], (Ce1,), dtype=jnp.float32) * 0.05
    w3 = jax.random.normal(ks[5], (Ce3, Csq, 3, 3), dtype=jnp.float32) * 0.2
    b3 = jax.random.normal(ks[6], (Ce3,), dtype=jnp.float32) * 0.05

    out = jax.block_until_ready(fire_forward(x, wsq, bsq, w1, b1, w3, b3))
    ref = fire_reference(x, wsq, bsq, w1, b1, w3, b3)

    assert out.shape == (N, Ce1 + Ce3, H, W), out.shape
    # bf16 MXU operands (f32 accumulation) => looser tolerance vs the f32 reference.
    max_err = float(jnp.max(jnp.abs(out - ref)))
    assert jnp.allclose(out, ref, atol=3e-2, rtol=3e-2), max_err

    print("KERNEL_OK")
</pallas_src>

<mosaic_0001>
module attributes {stable_mosaic.version = 11 : i64} {
  func.func @fire_kernel(%arg0: i32, %arg1: memref<8x256xbf16, #tpu.memory_space<vmem>>, %arg2: memref<8x256xf32, #tpu.memory_space<vmem>>, %arg3: memref<16x8xbf16, #tpu.memory_space<vmem>>, %arg4: memref<16x1xf32, #tpu.memory_space<vmem>>, %arg5: memref<8x16xbf16, #tpu.memory_space<vmem>>, %arg6: memref<8x1xf32, #tpu.memory_space<vmem>>, %arg7: memref<8x144xbf16, #tpu.memory_space<vmem>>, %arg8: memref<8x1xf32, #tpu.memory_space<vmem>>, %arg9: memref<16x256xf32, #tpu.memory_space<vmem>>, %arg10: memref<144x256xbf16, #tpu.memory_space<vmem>>) attributes {dimension_semantics = [#tpu.dimension_semantics<parallel>], iteration_bounds = array<i64: 2>, scalar_prefetch = 0 : i64, scratch_operands = 1 : i64, tpu.core_type = #tpu.core_type<tc>, window_params = [{transform_indices = @transform_0, window_bounds = array<i64: 8, 256>}, {pipeline_mode = #tpu.pipeline_mode<synchronous>, transform_indices = @transform_1, window_bounds = array<i64: 8, 256>}, {pipeline_mode = #tpu.pipeline_mode<synchronous>, transform_indices = @transform_2, window_bounds = array<i64: 16, 8>}, {pipeline_mode = #tpu.pipeline_mode<synchronous>, transform_indices = @transform_3, window_bounds = array<i64: 16, 1>}, {pipeline_mode = #tpu.pipeline_mode<synchronous>, transform_indices = @transform_4, window_bounds = array<i64: 8, 16>}, {pipeline_mode = #tpu.pipeline_mode<synchronous>, transform_indices = @transform_5, window_bounds = array<i64: 8, 1>}, {pipeline_mode = #tpu.pipeline_mode<synchronous>, transform_indices = @transform_6, window_bounds = array<i64: 8, 144>}, {pipeline_mode = #tpu.pipeline_mode<synchronous>, transform_indices = @transform_7, window_bounds = array<i64: 8, 1>}, {transform_indices = @transform_8, window_bounds = array<i64: 16, 256>}]} {
    %c0 = arith.constant 0 : index
    %c0_0 = arith.constant 0 : index
    %0 = vector.load %arg3[%c0, %c0_0] : memref<16x8xbf16, #tpu.memory_space<vmem>>, vector<16x8xbf16>
    %c0_1 = arith.constant 0 : index
    %c0_2 = arith.constant 0 : index
    %1 = vector.load %arg1[%c0_1, %c0_2] : memref<8x256xbf16, #tpu.memory_space<vmem>>, vector<8x256xbf16>
    %cst = arith.constant dense<0.000000e+00> : vector<16x256xf32>
    %2 = tpu.matmul %0, %1, %cst {dimension_numbers = #tpu.dot_dimension_numbers<[1], [0], [0], [1], [0, 0, 1, 1], [], []>} : vector<16x8xbf16>, vector<8x256xbf16>, vector<16x256xf32> -> vector<16x256xf32>
    %c0_3 = arith.constant 0 : index
    %c0_4 = arith.constant 0 : index
    %3 = vector.load %arg4[%c0_3, %c0_4] : memref<16x1xf32, #tpu.memory_space<vmem>>, vector<16x1xf32>
    %4 = vector.broadcast %3 : vector<16x1xf32> to vector<16x256xf32>
    %5 = arith.addf %2, %4 : vector<16x256xf32>
    %cst_5 = arith.constant 0.000000e+00 : f32
    %6 = vector.broadcast %cst_5 : f32 to vector<16x256xf32>
    %7 = arith.maximumf %5, %6 : vector<16x256xf32>
    %8 = arith.truncf %7 : vector<16x256xf32> to vector<16x256xbf16>
    %c0_6 = arith.constant 0 : index
    %c0_7 = arith.constant 0 : index
    %9 = vector.load %arg5[%c0_6, %c0_7] : memref<8x16xbf16, #tpu.memory_space<vmem>>, vector<8x16xbf16>
    %cst_8 = arith.constant dense<0.000000e+00> : vector<8x256xf32>
    %10 = tpu.matmul %9, %8, %cst_8 {dimension_numbers = #tpu.dot_dimension_numbers<[1], [0], [0], [1], [0, 0, 1, 1], [], []>} : vector<8x16xbf16>, vector<16x256xbf16>, vector<8x256xf32> -> vector<8x256xf32>
    %c0_9 = arith.constant 0 : index
    %c0_10 = arith.constant 0 : index
    %11 = vector.load %arg6[%c0_9, %c0_10] : memref<8x1xf32, #tpu.memory_space<vmem>>, vector<8x1xf32>
    %12 = vector.broadcast %11 : vector<8x1xf32> to vector<8x256xf32>
    %13 = arith.addf %10, %12 : vector<8x256xf32>
    %cst_11 = arith.constant 0.000000e+00 : f32
    %14 = vector.broadcast %cst_11 : f32 to vector<8x256xf32>
    %15 = arith.maximumf %13, %14 : vector<8x256xf32>
    %c0_12 = arith.constant 0 : index
    %c0_13 = arith.constant 0 : index
    %16 = vector.load %arg9[%c0_12, %c0_13] : memref<16x256xf32, #tpu.memory_space<vmem>>, vector<8x256xf32>
    tpu.vector_store %arg9[%c0_12, %c0_13], %15 {strides = array<i32>} : memref<16x256xf32, #tpu.memory_space<vmem>>, vector<8x256xf32>,
    %c17_i32 = arith.constant 17 : i32
    %17 = tpu.dynamic_rotate %7 by %c17_i32 dim 1 : vector<16x256xf32>, i32 -> vector<16x256xf32>
    %c0_14 = arith.constant 0 : index
    %c0_15 = arith.constant 0 : index
    %18 = vector.load %arg2[%c0_14, %c0_15] : memref<8x256xf32, #tpu.memory_space<vmem>>, vector<1x256xf32>
    %19 = vector.broadcast %18 : vector<1x256xf32> to vector<16x256xf32>
    %20 = arith.mulf %17, %19 : vector<16x256xf32>
    %21 = arith.truncf %20 : vector<16x256xf32> to vector<16x256xbf16>
    %c0_16 = arith.constant 0 : index
    %c0_17 = arith.constant 0 : index
    %22 = vector.load %arg10[%c0_16, %c0_17] : memref<144x256xbf16, #tpu.memory_space<vmem>>, vector<16x256xbf16>
    tpu.vector_store %arg10[%c0_16, %c0_17], %21 {strides = array<i32>} : memref<144x256xbf16, #tpu.memory_space<vmem>>, vector<16x256xbf16>,
    %c16_i32 = arith.constant 16 : i32
    %23 = tpu.dynamic_rotate %7 by %c16_i32 dim 1 : vector<16x256xf32>, i32 -> vector<16x256xf32>
    %c1 = arith.constant 1 : index
    %c0_18 = arith.constant 0 : index
    %24 = vector.load %arg2[%c1, %c0_18] : memref<8x256xf32, #tpu.memory_space<vmem>>, vector<1x256xf32>
    %25 = vector.broadcast %24 : vector<1x256xf32> to vector<16x256xf32>
    %26 = arith.mulf %23, %25 : vector<16x256xf32>
    %27 = arith.truncf %26 : vector<16x256xf32> to vector<16x256xbf16>
    %c16 = arith.constant 16 : index
    %c0_19 = arith.constant 0 : index
    %28 = vector.load %arg10[%c16, %c0_19] : memref<144x256xbf16, #tpu.memory_space<vmem>>, vector<16x256xbf16>
    tpu.vector_store %arg10[%c16, %c0_19], %27 {strides = array<i32>} : memref<144x256xbf16, #tpu.memory_space<vmem>>, vector<16x256xbf16>,
    %c15_i32 = arith.constant 15 : i32
    %29 = tpu.dynamic_rotate %7 by %c15_i32 dim 1 : vector<16x256xf32>, i32 -> vector<16x256xf32>
    %c2 = arith.constant 2 : index
    %c0_20 = arith.constant 0 : index
    %30 = vector.load %arg2[%c2, %c0_20] : memref<8x256xf32, #tpu.memory_space<vmem>>, vector<1x256xf32>
    %31 = vector.broadcast %30 : vector<1x256xf32> to vector<16x256xf32>
    %32 = arith.mulf %29, %31 : vector<16x256xf32>
    %33 = arith.truncf %32 : vector<16x256xf32> to vector<16x256xbf16>
    %c32 = arith.constant 32 : index
    %c0_21 = arith.constant 0 : index
    %34 = vector.load %arg10[%c32, %c0_21] : memref<144x256xbf16, #tpu.memory_space<vmem>>, vector<16x256xbf16>
    tpu.vector_store %arg10[%c32, %c0_21], %33 {strides = array<i32>} : memref<144x256xbf16, #tpu.memory_space<vmem>>, vector<16x256xbf16>,
    %c1_i32 = arith.constant 1 : i32
    %35 = tpu.dynamic_rotate %7 by %c1_i32 dim 1 : vector<16x256xf32>, i32 -> vector<16x256xf32>
    %c3 = arith.constant 3 : index
    %c0_22 = arith.constant 0 : index
    %36 = vector.load %arg2[%c3, %c0_22] : memref<8x256xf32, #tpu.memory_space<vmem>>, vector<1x256xf32>
    %37 = vector.broadcast %36 : vector<1x256xf32> to vector<16x256xf32>
    %38 = arith.mulf %35, %37 : vector<16x256xf32>
    %39 = arith.truncf %38 : vector<16x256xf32> to vector<16x256xbf16>
    %c48 = arith.constant 48 : index
    %c0_23 = arith.constant 0 : index
    %40 = vector.load %arg10[%c48, %c0_23] : memref<144x256xbf16, #tpu.memory_space<vmem>>, vector<16x256xbf16>
    tpu.vector_store %arg10[%c48, %c0_23], %39 {strides = array<i32>} : memref<144x256xbf16, #tpu.memory_space<vmem>>, vector<16x256xbf16>,
    %c64 = arith.constant 64 : index
    %c0_24 = arith.constant 0 : index
    %41 = vector.load %arg10[%c64, %c0_24] : memref<144x256xbf16, #tpu.memory_space<vmem>>, vector<16x256xbf16>
    tpu.vector_store %arg10[%c64, %c0_24], %8 {strides = array<i32>} : memref<144x256xbf16, #tpu.memory_space<vmem>>, vector<16x256xbf16>,
    %c255_i32 = arith.constant 255 : i32
    %42 = tpu.dynamic_rotate %7 by %c255_i32 dim 1 : vector<16x256xf32>, i32 -> vector<16x256xf32>
    %c4 = arith.constant 4 : index
    %c0_25 = arith.constant 0 : index
    %43 = vector.load %arg2[%c4, %c0_25] : memref<8x256xf32, #tpu.memory_space<vmem>>, vector<1x256xf32>
    %44 = vector.broadcast %43 : vector<1x256xf32> to vector<16x256xf32>
    %45 = arith.mulf %42, %44 : vector<16x256xf32>
    %46 = arith.truncf %45 : vector<16x256xf32> to vector<16x256xbf16>
    %c80 = arith.constant 80 : index
    %c0_26 = arith.constant 0 : index
    %47 = vector.load %arg10[%c80, %c0_26] : memref<144x256xbf16, #tpu.memory_space<vmem>>, vector<16x256xbf16>
    tpu.vector_store %arg10[%c80, %c0_26], %46 {strides = array<i32>} : memref<144x256xbf16, #tpu.memory_space<vmem>>, vector<16x256xbf16>,
    %c241_i32 = arith.constant 241 : i32
    %48 = tpu.dynamic_rotate %7 by %c241_i32 dim 1 : vector<16x256xf32>, i32 -> vector<16x256xf32>
    %c5 = arith.constant 5 : index
    %c0_27 = arith.constant 0 : index
    %49 = vector.load %arg2[%c5, %c0_27] : memref<8x256xf32, #tpu.memory_space<vmem>>, vector<1x256xf32>
    %50 = vector.broadcast %49 : vector<1x256xf32> to vector<16x256xf32>
    %51 = arith.mulf %48, %50 : vector<16x256xf32>
    %52 = arith.truncf %51 : vector<16x256xf32> to vector<16x256xbf16>
    %c96 = arith.constant 96 : index
    %c0_28 = arith.constant 0 : index
    %53 = vector.load %arg10[%c96, %c0_28] : memref<144x256xbf16, #tpu.memory_space<vmem>>, vector<16x256xbf16>
    tpu.vector_store %arg10[%c96, %c0_28], %52 {strides = array<i32>} : memref<144x256xbf16, #tpu.memory_space<vmem>>, vector<16x256xbf16>,
    %c240_i32 = arith.constant 240 : i32
    %54 = tpu.dynamic_rotate %7 by %c240_i32 dim 1 : vector<16x256xf32>, i32 -> vector<16x256xf32>
    %c6 = arith.constant 6 : index
    %c0_29 = arith.constant 0 : index
    %55 = vector.load %arg2[%c6, %c0_29] : memref<8x256xf32, #tpu.memory_space<vmem>>, vector<1x256xf32>
    %56 = vector.broadcast %55 : vector<1x256xf32> to vector<16x256xf32>
    %57 = arith.mulf %54, %56 : vector<16x256xf32>
    %58 = arith.truncf %57 : vector<16x256xf32> to vector<16x256xbf16>
    %c112 = arith.constant 112 : index
    %c0_30 = arith.constant 0 : index
    %59 = vector.load %arg10[%c112, %c0_30] : memref<144x256xbf16, #tpu.memory_space<vmem>>, vector<16x256xbf16>
    tpu.vector_store %arg10[%c112, %c0_30], %58 {strides = array<i32>} : memref<144x256xbf16, #tpu.memory_space<vmem>>, vector<16x256xbf16>,
    %c239_i32 = arith.constant 239 : i32
    %60 = tpu.dynamic_rotate %7 by %c239_i32 dim 1 : vector<16x256xf32>, i32 -> vector<16x256xf32>
    %c7 = arith.constant 7 : index
    %c0_31 = arith.constant 0 : index
    %61 = vector.load %arg2[%c7, %c0_31] : memref<8x256xf32, #tpu.memory_space<vmem>>, vector<1x256xf32>
    %62 = vector.broadcast %61 : vector<1x256xf32> to vector<16x256xf32>
    %63 = arith.mulf %60, %62 : vector<16x256xf32>
    %64 = arith.truncf %63 : vector<16x256xf32> to vector<16x256xbf16>
    %c128 = arith.constant 128 : index
    %c0_32 = arith.constant 0 : index
    %65 = vector.load %arg10[%c128, %c0_32] : memref<144x256xbf16, #tpu.memory_space<vmem>>, vector<16x256xbf16>
    tpu.vector_store %arg10[%c128, %c0_32], %64 {strides = array<i32>} : memref<144x256xbf16, #tpu.memory_space<vmem>>, vector<16x256xbf16>,
    %c0_33 = arith.constant 0 : index
    %c0_34 = arith.constant 0 : index
    %66 = vector.load %arg7[%c0_33, %c0_34] : memref<8x144xbf16, #tpu.memory_space<vmem>>, vector<8x144xbf16>
    %c0_35 = arith.constant 0 : index
    %c0_36 = arith.constant 0 : index
    %67 = vector.load %arg10[%c0_35, %c0_36] : memref<144x256xbf16, #tpu.memory_space<vmem>>, vector<144x256xbf16>
    %cst_37 = arith.constant dense<0.000000e+00> : vector<8x256xf32>
    %68 = tpu.matmul %66, %67, %cst_37 {dimension_numbers = #tpu.dot_dimension_numbers<[1], [0], [0], [1], [0, 0, 1, 1], [], []>} : vector<8x144xbf16>, vector<144x256xbf16>, vector<8x256xf32> -> vector<8x256xf32>
    %c0_38 = arith.constant 0 : index
    %c0_39 = arith.constant 0 : index
    %69 = vector.load %arg8[%c0_38, %c0_39] : memref<8x1xf32, #tpu.memory_space<vmem>>, vector<8x1xf32>
    %70 = vector.broadcast %69 : vector<8x1xf32> to vector<8x256xf32>
    %71 = arith.addf %68, %70 : vector<8x256xf32>
    %cst_40 = arith.constant 0.000000e+00 : f32
    %72 = vector.broadcast %cst_40 : f32 to vector<8x256xf32>
    %73 = arith.maximumf %71, %72 : vector<8x256xf32>
    %c8 = arith.constant 8 : index
    %c0_41 = arith.constant 0 : index
    %74 = vector.load %arg9[%c8, %c0_41] : memref<16x256xf32, #tpu.memory_space<vmem>>, vector<8x256xf32>
    tpu.vector_store %arg9[%c8, %c0_41], %73 {strides = array<i32>} : memref<16x256xf32, #tpu.memory_space<vmem>>, vector<8x256xf32>,
    return
  }
  func.func @transform_0(%arg0: i32) -> (i32, i32) {
    %c0_i32 = arith.constant 0 : i32
    %c0_i32_0 = arith.constant 0 : i32
    return %c0_i32, %arg0 : i32, i32
  }
  func.func @transform_1(%arg0: i32) -> (i32, i32) {
    %c0_i32 = arith.constant 0 : i32
    %c0_i32_0 = arith.constant 0 : i32
    %c0_i32_1 = arith.constant 0 : i32
    return %c0_i32, %c0_i32_0 : i32, i32
  }
  func.func @transform_2(%arg0: i32) -> (i32, i32) {
    %c0_i32 = arith.constant 0 : i32
    %c0_i32_0 = arith.constant 0 : i32
    %c0_i32_1 = arith.constant 0 : i32
    return %c0_i32, %c0_i32_0 : i32, i32
  }
  func.func @transform_3(%arg0: i32) -> (i32, i32) {
    %c0_i32 = arith.constant 0 : i32
    %c0_i32_0 = arith.constant 0 : i32
    %c0_i32_1 = arith.constant 0 : i32
    return %c0_i32, %c0_i32_0 : i32, i32
  }
  func.func @transform_4(%arg0: i32) -> (i32, i32) {
    %c0_i32 = arith.constant 0 : i32
    %c0_i32_0 = arith.constant 0 : i32
    %c0_i32_1 = arith.constant 0 : i32
    return %c0_i32, %c0_i32_0 : i32, i32
  }
  func.func @transform_5(%arg0: i32) -> (i32, i32) {
    %c0_i32 = arith.constant 0 : i32
    %c0_i32_0 = arith.constant 0 : i32
    %c0_i32_1 = arith.constant 0 : i32
    return %c0_i32, %c0_i32_0 : i32, i32
  }
  func.func @transform_6(%arg0: i32) -> (i32, i32) {
    %c0_i32 = arith.constant 0 : i32
    %c0_i32_0 = arith.constant 0 : i32
    %c0_i32_1 = arith.constant 0 : i32
    return %c0_i32, %c0_i32_0 : i32, i32
  }
  func.func @transform_7(%arg0: i32) -> (i32, i32) {
    %c0_i32 = arith.constant 0 : i32
    %c0_i32_0 = arith.constant 0 : i32
    %c0_i32_1 = arith.constant 0 : i32
    return %c0_i32, %c0_i32_0 : i32, i32
  }
  func.func @transform_8(%arg0: i32) -> (i32, i32) {
    %c0_i32 = arith.constant 0 : i32
    %c0_i32_0 = arith.constant 0 : i32
    return %c0_i32, %arg0 : i32, i32
  }
}

</mosaic_0001>

<bundles_post_ra>
// kernel: fire_forward.1
= control target key start
LH: loop header
LB: loop body
LE: loop exit
PB: predicated region body
PF: predicated region fallthrough
CT: control target
= control target key end

     0   :  { %s1282_s27 = smov 0   ;;  %s1284_s28 = smov 0   ;;  %s1535_s0 = inlined_call_operand.vmem [shape: bf16[8,512], index: 0, kind: input, shape index: {}]   ;;  %s1536_s1 = inlined_call_operand.vmem [shape: f32[8,256], index: 1, kind: input, shape index: {}]   ;;  %s1537_s2 = inlined_call_operand.vmem [shape: bf16[16,8], index: 2, kind: input, shape index: {}]   ;;  %s1538_s3 = inlined_call_operand.vmem [shape: f32[16,1], index: 3, kind: input, shape index: {}]   ;;  %s1539_s4 = inlined_call_operand.vmem [shape: bf16[8,16], index: 4, kind: input, shape index: {}]   ;;  %s1540_s5 = inlined_call_operand.vmem [shape: f32[8,1], index: 5, kind: input, shape index: {}]   ;;  %s1541_s6 = inlined_call_operand.vmem [shape: bf16[8,144], index: 6, kind: input, shape index: {}]   ;;  %s1542_s7 = inlined_call_operand.vmem [shape: f32[8,1], index: 7, kind: input, shape index: {}]   ;;  %s1543_s8 = inlined_call_operand.vmem [shape: f32[16,512], index: 8, kind: output, shape index: {}]  }
   0x1   :  { %s1286_s29 = smov 0  }
   0x2 LB: > { %s1295_s30 = sadd.s32 4294967295, %s1226_s29   ;;  %s1297_s9 = sadd.s32 1, %s1226_s29   ;;  %s1226_s29 = sphi %s1286_s29, %s1547_s29   ;;  %s1222_s28 = sphi %s1284_s28, %s1546_s28   ;;  %s1218_s27 = sphi %s1282_s27, %s1545_s27  }
   0x3   : > { %s195_s10 = ssub.s32 %s1226_s29, %s1297_s9  ;;  %s198_s11 = sadd.s32 1, %s1222_s28 }
   0x4   : > { %p196_p0 = scmp.eq.s32.totalorder %s195_s10, 0  ;;  %p208_p1 = scmp.ne.s32.totalorder %s1222_s28, %s1218_s27 }
   0x5   : > { %p209_p2 = scmp.eq.s32.totalorder %s1295_s30, 1  ;;  %p1066_p3 = scmp.ge.s32.totalorder %s1226_s29, 1 }
   0x6   : > { %s1305_s12 = scalar_select %p196_p0, %s1222_s28, %s198_s11  }
   0x7   : > { %p1307_p4 = por %p209_p2, %p208_p1  ;;  %p263_p5 = scmp.lt.s32.totalorder %s1226_s29, 3 }
   0x9   : > { %p264_p6 = pnand %p1066_p3, %p263_p5 }
   0xa   : > { %s1068_s14 = sshll.u32 (!%p264_p6), %s1295_s30, 1  ;;  %s1229_s25 = smov (!%p264_p6), 113  }
   0xb   : > { %267 = sbr.rel (%p264_p6) target bundleno = 620 (0x26c), region = 52  ;;  %p297_p7 = scmp.lt.s32.totalorder (!%p264_p6), %s1068_s14, 3 }
   0xc   : > { %s1230_s26 = smov (!%p264_p6), 112   ;;  %s1231_s29 = smov (!%p264_p6), 127  }
   0xd   : > { %s1232_s10 = smov (!%p264_p6), 1   ;;  %s1233_s15 = smov (!%p264_p6), 15  }
   0xe   : > { %s1234_s16 = smov (!%p264_p6), 16   ;;  %s1235_s17 = smov (!%p264_p6), 17  }
   0xf   : > { %s1236_s18 = smov (!%p264_p6), 111  }
  0x10   : > { %v1228_v0 = vmov 0   ;;  %v307_v1 = vld [vmem:[%s1538_s3] sm:$0xff]  ;;  %s1549_s14 = smov (!%p297_p7, %s1068_s14), 3  ;;  %v308_v2 = vld [vmem:[%s1538_s3 + $0x8] sm:$0xff]  ;;  %vm333_vm0 = vcmask 1043456   ;;  %vm329_vm1 = vcmask 64512   ;;  %v453_v39 = vlaneseq }
  0x11   : > { %372 = vmatprep.mubr.bf16.mxu1 %v1228_v0  ;;  %1197 = vset.pattern.permute.xlu0 %v1228_v0  ;;  %s1069_s19 = sshll.u32 %s1549_s14, 2  ;;  %v1201_v7 = vld [vmem:[%s1537_s2] sm:$0xff]   ;;  %vm396_vm2 = vcmask 130048  }
  0x12   : > { %311 = vperm.xlu0 %1197, %v307_v1   ;;  %1198 = vset.pattern.permute.xlu1 %v1228_v0  ;;  %s300_s22 = scalar_lea.vmem %s1535_s0, %s1069_s19  ;;  %v389_v24 = vld [vmem:[%s1539_s4] sm:$0xf]  ;;  %v463_v42 = vshrl.u32 %v453_v39, 7  ;;  %v1376_v44 = vand.u32 127, %v453_v39 }
  0x13   : > { %v306_v3 = vld [vmem:[%s300_s22] sm:$0xff] }
  0x14   : > { %v1072_v4 = vcombine.high %v306_v3, %v306_v3  ;;  %v1071_v5 = vcombine.low %v306_v3, %v306_v3  ;;  %v390_v25 = vld [vmem:[%s1540_s5] sm:$0xff]  ;;  %v1380_v46 = vsub.s32 0, %v463_v42  ;;  %v1382_v47 = vsub.s32 1, %v463_v42 }
  0x15   : > { %v1356_v26 = vld [vmem:[%s1541_s6] sm:$0xff]  ;;  %vm730_vm3 = vcmp.lt.s32.totalorder %v1376_v44, 112  ;;  %vm686_vm4 = vcmp.lt.s32.totalorder %v1376_v44, 113  ;;  %vm642_vm5 = vcmp.lt.s32.totalorder %v1376_v44, 127  ;;  %vm586_vm6 = vcmp.lt.s32.totalorder %v1376_v44, 1 }
  0x16   : > { %316 = vperm.xlu0 %1197, %v308_v2   ;;  %1073 = vmatprep.subr.msk.bf16.mxu1 %vm333_vm0, %v1072_v4  ;;  %v335_v6 = vsel %vm333_vm0, %v1071_v5, 0  ;;  %v1102_v27 = vcombine.high %v1356_v26, %v1356_v26  ;;  %v829_v28 = vld [vmem:[%s1542_s7] sm:$0xff]  ;;  %vm542_vm7 = vcmp.lt.s32.totalorder %v1376_v44, 15  ;;  %vm498_vm8 = vcmp.lt.s32.totalorder %v1376_v44, 16 }
  0x17   : > { %355 = vmatpush1.bf16.msra.mxu1 %v335_v6  ;;  %v1095_v48 = vld [vmem:[%s1536_s1 + $0x6] ss:$8 sm:$0x3]  ;;  %v1092_v52 = vld [vmem:[%s1536_s1 + $0x5] ss:$8 sm:$0x3] }
  0x18   : > { %1121 = vmatprep.mubr.msk.bf16.mxu0 %vm396_vm2, %v1102_v27  ;;  %v741_v51 = vrot.slane %v1095_v48, %v1380_v46  ;;  %v745_v53 = vrot.slane %v1095_v48, %v1382_v47  ;;  %v697_v58 = vrot.slane %v1092_v52, %v1380_v46  ;;  %v701_v59 = vrot.slane %v1092_v52, %v1382_v47  ;;  %v1089_v63 = vld [vmem:[%s1536_s1 + $0x4] ss:$8 sm:$0x3] }
  0x19   : > { %vm455_vm9 = vcmp.lt.s32.totalorder %v1376_v44, 17  ;;  %vm774_vm10 = vcmp.lt.s32.totalorder %v1376_v44, 111 }
  0x1a   : > { %1074 = vmatmul.mubr.msk.bf16.vlgmr.msra.gmra.mxu1 %vm329_vm1, %v1201_v7 }
  0x1b   : > { %432 = vmatprep.mubr.bf16.mxu1 %v1228_v0 }
  0x8d   : > { %v312_v8 = vpop.permute.xlu0 %311 }
  0x91   : > { %v317_v13 = vpop.permute.xlu0 %316 }
  0xda   : > { %v374_v9 = vpop.f32.mrf.mxu1 }
  0xdb   : > { %v375_v10 = vadd.f32 %v374_v9, %v312_v8  ;;  %v653_v9 = vrot.slane %v1089_v63, %v1380_v46 }
  0xdc   : > { %v376_v11 = vpop.f32.mrf.mxu1 }
  0xdd   : > { %v383_v12 = vmax.f32 %v375_v10, 0.0  ;;  %v377_v15 = vadd.f32 %v376_v11, %v312_v8  ;;  %v657_v10 = vrot.slane %v1089_v63, %v1382_v47 }
  0xde   : > { %v378_v14 = vpop.f32.mrf.mxu1 }
  0xdf   : > { %v379_v16 = vadd.f32 %v378_v14, %v317_v13  ;;  %678 = vrot.lane.b32.xlu0 %v383_v12, %s1229_s25  ;;  %722 = vrot.lane.b32.xlu1 %v383_v12, %s1230_s26  ;;  %v384_v20 = vmax.f32 %v377_v15, 0.0 }
  0xe0   : > { %v380_v17 = vpop.f32.mrf.mxu1 }
  0xe1   : > { %v385_v18 = vmax.f32 %v379_v16, 0.0  ;;  %v381_v19 = vadd.f32 %v380_v17, %v317_v13 }
  0xe3   : > { %v386_v21 = vmax.f32 %v381_v19, 0.0  ;;  %634 = vrot.lane.b32.xlu0 %v383_v12, %s1231_s29  ;;  %724 = vrot.lane.b32.xlu1 %v385_v18, %s1230_s26  ;;  %v1330_v23 = vpack.c.bf16 %v385_v18, %v383_v12 }
  0xe5   : > { %v1328_v22 = vpack.c.bf16 %v386_v21, %v384_v20 }
  0xe7   : > { %414 = vmatprep.subr.bf16.mxu1 %v1328_v22  ;;  %578 = vrot.lane.b32.xlu0 %v383_v12, %s1232_s10 }
  0xe8   : > { %680 = vrot.lane.b32.xlu1 %v385_v18, %s1229_s25  ;;  %415 = vmatpush1.bf16.msra.mxu1 %v1330_v23 }
  0xeb   : > { %534 = vrot.lane.b32.xlu0 %v383_v12, %s1233_s15  ;;  %1075 = vmatmul.mubr.msk.bf16.vlgmr.msra.gmra.mxu1 %vm396_vm2, %v389_v24 }
  0xec   : > { %636 = vrot.lane.b32.xlu1 %v385_v18, %s1231_s29 }
  0xef   : > { %490 = vrot.lane.b32.xlu0 %v383_v12, %s1234_s16 }
  0xf0   : > { %580 = vrot.lane.b32.xlu1 %v385_v18, %s1232_s10 }
  0xf3   : > { %445 = vrot.lane.b32.xlu0 %v383_v12, %s1235_s17 }
  0xf4   : > { %536 = vrot.lane.b32.xlu1 %v385_v18, %s1233_s15 }
  0xf7   : > { %726 = vrot.lane.b32.xlu0 %v384_v20, %s1230_s26 }
  0xf8   : > { %492 = vrot.lane.b32.xlu1 %v385_v18, %s1234_s16 }
  0xfb   : > { %682 = vrot.lane.b32.xlu0 %v384_v20, %s1229_s25 }
  0xfc   : > { %447 = vrot.lane.b32.xlu1 %v385_v18, %s1235_s17 }
  0xff   : > { %638 = vrot.lane.b32.xlu0 %v384_v20, %s1231_s29 }
 0x100   : > { %728 = vrot.lane.b32.xlu1 %v386_v21, %s1230_s26 }
 0x103   : > { %766 = vrot.lane.b32.xlu0 %v383_v12, %s1236_s18 }
 0x104   : > { %684 = vrot.lane.b32.xlu1 %v386_v21, %s1229_s25  ;;  %s293_s25 = sand.u32 1, %s1218_s27   ;;  %s1145_s27 = sshll.u32 (%p1307_p4), %s1295_s30, 4 }
 0x105   : > { %s1067_s26 = sshll.u32 %s293_s25, 5  ;;  %s988_s14 = scalar_lea.vmem (%p1307_p4), %s1543_s8, %s1145_s27 }
 0x107   : > { %582 = vrot.lane.b32.xlu0 %v384_v20, %s1232_s10 }
 0x108   : > { %640 = vrot.lane.b32.xlu1 %v386_v21, %s1231_s29  ;;  %s295_s29 = scalar_lea.vmem [#allocation3], %s1067_s26 }
 0x10b   : > { %538 = vrot.lane.b32.xlu0 %v384_v20, %s1233_s15 }
 0x10c   : > { %768 = vrot.lane.b32.xlu1 %v385_v18, %s1236_s18 }
 0x10f   : > { %494 = vrot.lane.b32.xlu0 %v384_v20, %s1234_s16 }
 0x110   : > { %584 = vrot.lane.b32.xlu1 %v386_v21, %s1232_s10 }
 0x113   : > { %449 = vrot.lane.b32.xlu0 %v384_v20, %s1235_s17 }
 0x114   : > { %540 = vrot.lane.b32.xlu1 %v386_v21, %s1233_s15 }
 0x117   : > { %770 = vrot.lane.b32.xlu0 %v384_v20, %s1236_s18 }
 0x118   : > { %496 = vrot.lane.b32.xlu1 %v386_v21, %s1234_s16 }
 0x11b   : > { %393 = vperm.xlu0 %1197, %v390_v25  }
 0x11c   : > { %451 = vrot.lane.b32.xlu1 %v386_v21, %s1235_s17 }
 0x120   : > { %772 = vrot.lane.b32.xlu1 %v386_v21, %s1236_s18 }
 0x124   : > { %832 = vperm.xlu1 %1198, %v829_v28  }
 0x151   : > { %v679_v29 = vpop.permute.xlu0 %678  ;;  %v723_v30 = vpop.permute.xlu1 %722 }
 0x155   : > { %v635_v31 = vpop.permute.xlu0 %634  ;;  %v725_v32 = vpop.permute.xlu1 %724 }
 0x159   : > { %v1364_v33 = vpop.permute.xlu0 %578 }
 0x15a   : > { %v681_v34 = vpop.permute.xlu1 %680 }
 0x15d   : > { %v1366_v35 = vpop.permute.xlu0 %534 }
 0x15e   : > { %v637_v36 = vpop.permute.xlu1 %636 }
 0x161   : > { %v1368_v37 = vpop.permute.xlu0 %490 }
 0x162   : > { %v1370_v38 = vpop.permute.xlu1 %580 }
 0x165   : > { %v1372_v40 = vpop.permute.xlu0 %445 }
 0x166   : > { %v1374_v41 = vpop.permute.xlu1 %536 }
 0x169   : > { %v727_v43 = vpop.permute.xlu0 %726 }
 0x16a   : > { %v1378_v45 = vpop.permute.xlu1 %492  ;;  %v731_v54 = vsel %vm730_vm3, %v723_v30, %v727_v43  ;;  %v733_v55 = vsel %vm730_vm3, %v727_v43, %v723_v30 }
 0x16b   : > { %v748_v62 = vmul.f32 %v741_v51, %v731_v54  ;;  %v749_v1 = vmul.f32 %v745_v53, %v733_v55 }
 0x16d   : > { %v683_v49 = vpop.permute.xlu0 %682 }
 0x16e   : > { %v1388_v50 = vpop.permute.xlu1 %447  ;;  %v687_v3 = vsel %vm686_vm4, %v679_v29, %v683_v49  ;;  %v689_v4 = vsel %vm686_vm4, %v683_v49, %v679_v29  ;;  %v1081_v49 = vld [vmem:[%s1536_s1 + $0x2] ss:$8 sm:$0x3] }
 0x16f   : > { %v704_v13 = vmul.f32 %v697_v58, %v687_v3  ;;  %v705_v14 = vmul.f32 %v701_v59, %v689_v4  ;;  %v553_v55 = vrot.slane %v1081_v49, %v1380_v46 }
 0x171   : > { %v639_v56 = vpop.permute.xlu0 %638 }
 0x172   : > { %v729_v57 = vpop.permute.xlu1 %728  ;;  %v643_v17 = vsel %vm642_vm5, %v635_v31, %v639_v56  ;;  %v645_v18 = vsel %vm642_vm5, %v639_v56, %v635_v31  ;;  %v1084_v31 = vld [vmem:[%s1536_s1 + $0x3] ss:$8 sm:$0x3]  ;;  %v557_v56 = vrot.slane %v1081_v49, %v1382_v47 }
 0x173   : > { %v732_v60 = vsel %vm730_vm3, %v725_v32, %v729_v57  ;;  %v734_v61 = vsel %vm730_vm3, %v729_v57, %v725_v32  ;;  %v660_v28 = vmul.f32 %v653_v9, %v643_v17  ;;  %v661_v29 = vmul.f32 %v657_v10, %v645_v18 }
 0x174   : > { %v750_v0 = vmul.f32 %v741_v51, %v732_v60  ;;  %v751_v2 = vmul.f32 %v745_v53, %v734_v61  ;;  %v597_v48 = vrot.slane %v1084_v31, %v1380_v46  ;;  %v1078_v60 = vld [vmem:[%s1536_s1 + $0x1] ss:$8 sm:$0x3] }
 0x175   : > { %v1405_v5 = vpop.permute.xlu0 %766  ;;  %v513_v3 = vrot.slane %v1078_v60, %v1382_v47 }
 0x176   : > { %v685_v6 = vpop.permute.xlu1 %684  ;;  %v1161_v7 = vpack.c.bf16 %v751_v2, %v749_v1  ;;  %v1160_v8 = vpack.c.bf16 %v750_v0, %v748_v62  ;;  %v509_v2 = vrot.slane %v1078_v60, %v1380_v46 }
 0x177   : > { %v688_v11 = vsel %vm686_vm4, %v681_v34, %v685_v6  ;;  %v690_v12 = vsel %vm686_vm4, %v685_v6, %v681_v34 }
 0x178   : > { %v706_v15 = vmul.f32 %v697_v58, %v688_v11  ;;  %v707_v16 = vmul.f32 %v701_v59, %v690_v12  ;;  %934 = vmatprep.subr.bf16.mxu0 %v1161_v7 }
 0x179   : > { %935 = vmatpush1.bf16.msra.mxu0 %v1160_v8  ;;  %v583_v19 = vpop.permute.xlu0 %582 }
 0x17a   : > { %v641_v20 = vpop.permute.xlu1 %640  ;;  %v1159_v21 = vpack.c.bf16 %v707_v16, %v705_v14  ;;  %v1158_v24 = vpack.c.bf16 %v706_v15, %v704_v13  ;;  %v587_v51 = vsel %vm586_vm6, %v1364_v33, %v583_v19  ;;  %v589_v52 = vsel %vm586_vm6, %v583_v19, %v1364_v33 }
 0x17b   : > { %v644_v25 = vsel %vm642_vm5, %v637_v36, %v641_v20  ;;  %v646_v27 = vsel %vm642_vm5, %v641_v20, %v637_v36  ;;  %v601_v36 = vrot.slane %v1084_v31, %v1382_v47  ;;  %v604_v33 = vmul.f32 %v597_v48, %v589_v52  ;;  %v1098_v20 = vld [vmem:[%s1536_s1 + $0x7] ss:$8 sm:$0x3] }
 0x17c   : > { %v662_v30 = vmul.f32 %v653_v9, %v644_v25  ;;  %v663_v32 = vmul.f32 %v657_v10, %v646_v27  ;;  %936 = vmatprep.subr.bf16.mxu0 %v1159_v21  ;;  %v789_v31 = vrot.slane %v1098_v20, %v1382_v47 }
 0x17d   : > { %937 = vmatpush1.bf16.msra.mxu0 %v1158_v24  ;;  %v539_v34 = vpop.permute.xlu0 %538  ;;  %v605_v59 = vmul.f32 %v601_v36, %v587_v51 }
 0x17e   : > { %v1426_v39 = vpop.permute.xlu1 %768  ;;  %v1157_v42 = vpack.c.bf16 %v663_v32, %v661_v29  ;;  %v1156_v43 = vpack.c.bf16 %v662_v30, %v660_v28  ;;  %v543_v62 = vsel %vm542_vm7, %v1366_v35, %v539_v34  ;;  %v545_v63 = vsel %vm542_vm7, %v539_v34, %v1366_v35 }
 0x17f   : > { %v560_v35 = vmul.f32 %v553_v55, %v545_v63  ;;  %v561_v7 = vmul.f32 %v557_v56, %v543_v62  ;;  %v785_v32 = vrot.slane %v1098_v20, %v1380_v46 }
 0x180   : > { %938 = vmatprep.subr.bf16.mxu0 %v1157_v42 }
 0x181   : > { %939 = vmatpush1.bf16.msra.mxu0 %v1156_v43  ;;  %v495_v53 = vpop.permute.xlu0 %494 }
 0x182   : > { %940 = vmatprep.subr.bf16.mxu0 %v1328_v22  ;;  %v585_v54 = vpop.permute.xlu1 %584  ;;  %v499_v11 = vsel %vm498_vm8, %v1368_v37, %v495_v53  ;;  %v501_v12 = vsel %vm498_vm8, %v495_v53, %v1368_v37 }
 0x183   : > { %v588_v57 = vsel %vm586_vm6, %v1370_v38, %v585_v54  ;;  %v590_v58 = vsel %vm586_vm6, %v585_v54, %v1370_v38  ;;  %v516_v19 = vmul.f32 %v509_v2, %v501_v12  ;;  %v517_v37 = vmul.f32 %v513_v3, %v499_v11 }
 0x184   : > { %v606_v22 = vmul.f32 %v597_v48, %v590_v58  ;;  %v607_v61 = vmul.f32 %v601_v36, %v588_v57 }
 0x185   : > { %941 = vmatpush1.bf16.msra.mxu0 %v1330_v23  ;;  %v460_v23 = vld [vmem:[%s1536_s1] ss:$8 sm:$0x3]  ;;  %v450_v8 = vpop.permute.xlu0 %449 }
 0x186   : > { %v541_v38 = vpop.permute.xlu1 %540  ;;  %v1153_v0 = vpack.c.bf16 %v607_v61, %v605_v59  ;;  %v1152_v1 = vpack.c.bf16 %v606_v22, %v604_v33  ;;  %v465_v15 = vrot.slane %v460_v23, %v1380_v46  ;;  %v469_v16 = vrot.slane %v460_v23, %v1382_v47 }
 0x187   : > { %v544_v4 = vsel %vm542_vm7, %v1374_v41, %v541_v38  ;;  %v546_v6 = vsel %vm542_vm7, %v541_v38, %v1374_v41  ;;  %v456_v25 = vsel %vm455_vm9, %v1372_v40, %v450_v8  ;;  %v458_v27 = vsel %vm455_vm9, %v450_v8, %v1372_v40 }
 0x188   : > { %v562_v9 = vmul.f32 %v553_v55, %v546_v6  ;;  %v563_v10 = vmul.f32 %v557_v56, %v544_v4  ;;  %942 = vmatprep.subr.bf16.mxu0 %v1153_v0  ;;  %v472_v40 = vmul.f32 %v465_v15, %v458_v27  ;;  %v473_v43 = vmul.f32 %v469_v16, %v456_v25 }
 0x189   : > { %943 = vmatpush1.bf16.msra.mxu0 %v1152_v1  ;;  %v1101_v33 = vcombine.low %v1356_v26, %v1356_v26 }
 0x18a   : > { %v497_v41 = vpop.permute.xlu1 %496  ;;  %v1151_v13 = vpack.c.bf16 %v563_v10, %v561_v7  ;;  %v1150_v14 = vpack.c.bf16 %v562_v9, %v560_v35 }
 0x18b   : > { %v500_v17 = vsel %vm498_vm8, %v1378_v45, %v497_v41  ;;  %v502_v18 = vsel %vm498_vm8, %v497_v41, %v1378_v45  ;;  %v771_v45 = vpop.permute.xlu0 %770 }
 0x18c   : > { %v518_v21 = vmul.f32 %v509_v2, %v502_v18  ;;  %v519_v24 = vmul.f32 %v513_v3, %v500_v17  ;;  %944 = vmatprep.subr.bf16.mxu0 %v1151_v13  ;;  %v775_v49 = vsel %vm774_vm10, %v1405_v5, %v771_v45  ;;  %v777_v46 = vsel %vm774_vm10, %v771_v45, %v1405_v5 }
 0x18d   : > { %945 = vmatpush1.bf16.msra.mxu0 %v1150_v14  ;;  %v792_v54 = vmul.f32 %v785_v32, %v775_v49  ;;  %v793_v55 = vmul.f32 %v789_v31, %v777_v46 }
 0x18e   : > { %v452_v28 = vpop.permute.xlu1 %451  ;;  %v1149_v29 = vpack.c.bf16 %v519_v24, %v517_v37  ;;  %v1148_v30 = vpack.c.bf16 %v518_v21, %v516_v19 }
 0x18f   : > { %v457_v34 = vsel %vm455_vm9, %v1388_v50, %v452_v28  ;;  %v459_v42 = vsel %vm455_vm9, %v452_v28, %v1388_v50 }
 0x190   : > { %v474_v48 = vmul.f32 %v465_v15, %v459_v42  ;;  %v475_v36 = vmul.f32 %v469_v16, %v457_v34  ;;  %946 = vmatprep.subr.bf16.mxu0 %v1149_v29 }
 0x191   : > { %947 = vmatpush1.bf16.msra.mxu0 %v1148_v30 }
 0x192   : > { %v773_v47 = vpop.permute.xlu1 %772  ;;  %v1147_v51 = vpack.c.bf16 %v475_v36, %v473_v43  ;;  %v1146_v52 = vpack.c.bf16 %v474_v48, %v472_v40 }
 0x193   : > { %v776_v50 = vsel %vm774_vm10, %v1426_v39, %v773_v47  ;;  %v778_v53 = vsel %vm774_vm10, %v773_v47, %v1426_v39 }
 0x194   : > { %v794_v56 = vmul.f32 %v785_v32, %v776_v50  ;;  %v795_v57 = vmul.f32 %v789_v31, %v778_v53  ;;  %948 = vmatprep.subr.bf16.mxu0 %v1147_v51 }
 0x195   : > { %949 = vmatpush1.bf16.msra.mxu0 %v1146_v52 }
 0x196   : > { %v1163_v5 = vpack.c.bf16 %v795_v57, %v793_v55  ;;  %v1162_v58 = vpack.c.bf16 %v794_v56, %v792_v54  ;;  %v394_v59 = vpop.permute.xlu0 %393 }
 0x198   : > { %964 = vmatprep.subr.bf16.mxu0 %v1163_v5 }
 0x199   : > { %965 = vmatpush2.bf16.msra.mxu0 %v1162_v58 }
 0x19c   : > { %967 = vmatmul.mubr.bf16.vlgmr.msra.gmra.mxu0 %v1101_v33 }
 0x19f   : > { %v833_v0 = vpop.permute.xlu1 %832 }
 0x1ab   : > { %v434_v60 = vpop.f32.mrf.mxu1 }
 0x1ac   : > { %v435_v44 = vadd.f32 %v434_v60, %v394_v59 }
 0x1ad   : > { %v436_v39 = vpop.f32.mrf.mxu1 }
 0x1ae   : > { %v441_v22 = vmax.f32 %v435_v44, 0.0  ;;  %v437_v61 = vadd.f32 %v436_v39, %v394_v59 }
 0x1af   : > { %v438_v62 = vpop.f32.mrf.mxu1 }
 0x1b0   : > { %443 = vst [vmem:[%s295_s29] sm:$0xff] %v441_v22  ;;  %v442_v63 = vmax.f32 %v437_v61, 0.0 }
 0x1b1   : > { %v439_v38 = vpop.f32.mrf.mxu1 }
 0x1b2   : > { %444 = vst [vmem:[%s295_s29 + $0x8] sm:$0xff] %v442_v63 }
 0x1b7   : > { %v1001_v23 = vld [vmem:[%s295_s29] sm:$0xff] (%p1307_p4) }
 0x1b8   : > { %1002 = vst [vmem:[%s988_s14] sm:$0xff] (%p1307_p4), %v1001_v23 }
 0x1b9   : > { %v1003_v8 = vld [vmem:[%s295_s29 + $0x8] sm:$0xff] (%p1307_p4) }
 0x1ba   : > { %1004 = vst [vmem:[%s988_s14 + $0x8] sm:$0xff] (%p1307_p4), %v1003_v8 }
 0x25c   : > { %v968_v1 = vpop.f32.mrf.mxu0 }
 0x25d   : > { %v969_v2 = vadd.f32 %v968_v1, %v833_v0 }
 0x25e   : > { %v970_v26 = vpop.f32.mrf.mxu0 }
 0x25f   : > { %v975_v3 = vmax.f32 %v969_v2, 0.0  ;;  %v971_v4 = vadd.f32 %v970_v26, %v833_v0  ;;  %985 = sbr.rel (!%p1307_p4) target bundleno = 620 (0x26c), region = 56 }
 0x260   : > { %v972_v6 = vpop.f32.mrf.mxu0 }
 0x261   : > { %977 = vst [vmem:[%s295_s29 + $0x10] sm:$0xff] %v975_v3  ;;  %v976_v35 = vmax.f32 %v971_v4, 0.0 }
 0x262   : > { %v973_v7 = vpop.f32.mrf.mxu0 }
 0x263   : > { %978 = vst [vmem:[%s295_s29 + $0x18] sm:$0xff] %v976_v35 }
 0x268   : > { %v1005_v9 = vld [vmem:[%s295_s29 + $0x10] sm:$0xff] }
 0x269   : > { %1006 = vst [vmem:[%s988_s14 + $0x20] sm:$0xff] %v1005_v9 }
 0x26a   : > { %v1007_v10 = vld [vmem:[%s295_s29 + $0x18] sm:$0xff] }
 0x26b   : > { %1008 = vst [vmem:[%s988_s14 + $0x28] sm:$0xff] %v1007_v10 }
 0x26c PF: > { %p15_p8 = scmp.ge.s32.totalorder %s1297_s9, 4   ;;  %s1545_s27 = smov %s1222_s28 }
 0x26d   : > { %s1546_s28 = smov %s1305_s12  ;;  %s1547_s29 = smov %s1297_s9 }
 0x26e   :  { %17 = sbr.rel (!%p15_p8) target bundleno = 2 (0x2), region = 112 }

</bundles_post_ra>
